<compile_context>
chip_gen: v5e
topology: v5e:2x2
jax: 0.10.0
libtpu: 0.0.40
codegen_flags: <defaults>
</compile_context>

<pallas_src>
import functools

import jax
import jax.numpy as jnp
from jax.experimental import pallas as pl
from jax.experimental.pallas import tpu as pltpu


def _hops_kernel(a_ref, x_ref, ho_ref, *, gdep, alpha, ct, seq_len):
    """One (batch, channel-tile) block of the mix-hop propagation.

    a_ref : (V, V)             row-normalized adjacency with self loops
    x_ref : (V, Ct*L)          input slab, channel-major lane order
    ho_ref: (gdep, Ct, V, L)   hops 1..gdep, stored channel-major (MLP layout)
    """
    a = a_ref[...]
    x = x_ref[...]
    x32 = x.astype(jnp.float32)
    ax = alpha * x32                       # hoisted out of the hop loop
    beta = 1.0 - alpha

    h = x32                                # f32 carry across hops
    for k in range(gdep):                  # gdep is static -> unrolled
        # nconv: one wide (V,V) @ (V, Ct*L) MXU matmul, f32 accumulation.
        # (matmul input cast back to the I/O dtype to keep the MXU in bf16
        #  when inputs are bf16; the mix itself stays in f32.)
        prop = jnp.dot(a, h.astype(x.dtype), preferred_element_type=jnp.float32)
        h = ax + beta * prop
        hk = h.astype(ho_ref.dtype)
        # Write-side relayout: per-channel static lane slices -> (Ct, V, L)
        # channel-major output.  Rides the idle XLU; saves an XLA transpose
        # (a full HBM round trip of the hop tensor).
        for c in range(ct):
            ho_ref[k, c] = hk[:, c * seq_len:(c + 1) * seq_len]


def _mlp_kernel(w0_ref, wr_ref, b_ref, x0_ref, hops_ref, o_ref):
    """Fused 1x1 conv without concat: W0 @ x + W_rest @ hops + b.

    w0_ref  : (c_out, C)        hops_ref: (gdep*C, TVL)
    wr_ref  : (c_out, gdep*C)   o_ref   : (c_out, TVL)
    b_ref   : (c_out, 1) f32    x0_ref  : (C, TVL)
    """
    acc = jnp.dot(w0_ref[...], x0_ref[...], preferred_element_type=jnp.float32)
    acc = acc + jnp.dot(wr_ref[...], hops_ref[...],
                        preferred_element_type=jnp.float32)
    o_ref[...] = (acc + b_ref[...]).astype(o_ref.dtype)


def _mlp_kernel_x_only(w0_ref, b_ref, x0_ref, o_ref):
    """gdep == 0 path: out = W0 @ x + b."""
    acc = jnp.dot(w0_ref[...], x0_ref[...], preferred_element_type=jnp.float32)
    o_ref[...] = (acc + b_ref[...]).astype(o_ref.dtype)


def mixprop_forward(x, adj, w, b, *, gdep, alpha,
                    max_free_lanes=None, max_vl_tile=4096):
    N, C, V, L = x.shape
    c_out = w.shape[0]
    KC = (gdep + 1) * C
    assert adj.shape == (V, V)
    assert w.shape == (c_out, KC)
    VL = V * L
    CL = C * L
    isz = x.dtype.itemsize

    # 1) Batch-invariant adjacency normalization (hoisted, done once in XLA).
    a = adj.astype(jnp.float32) + jnp.eye(V, dtype=jnp.float32)
    a = (a / jnp.sum(a, axis=1, keepdims=True)).astype(x.dtype)

    w = w.astype(x.dtype)
    w0 = w[:, :C]                                  # hop-0 columns
    b2 = b.reshape(c_out, 1).astype(jnp.float32)

    x0 = x.reshape(N, C, VL)                       # free (metadata-only) reshape

    hops = None
    wr = None
    if gdep > 0:
        # Channel tile: largest divisor of C whose fused lane width Ct*L fits
        # the dtype-aware cap (1024 lanes f32 / 2048 bf16 keeps double-buffered
        # blocks + f32 temporaries inside v5e's 16 MiB scoped-VMEM default).
        # Ct | C  =>  no ragged tail tiles (contraction dim V is never partial).
        if max_free_lanes is None:
            max_free_lanes = 2048 if isz <= 2 else 1024
        ct = 1
        for cand in range(1, C + 1):
            if C % cand == 0 and cand * L <= max_free_lanes:
                ct = cand
        tf = ct * L
        ncb = C // ct

        # x permuted once to (N, V, C, L) -> (N, V, C*L) so each hop is one
        # wide-lane MXU matmul (the only remaining XLA copy, x-sized).
        x2 = jnp.transpose(x, (0, 2, 1, 3)).reshape(N, V, CL)

        hops_cost = pl.CostEstimate(
            flops=int(2 * N * gdep * V * V * CL),
            transcendentals=0,
            bytes_accessed=int(isz * (N * V * CL + N * gdep * C * V * L)
                               + isz * V * V))

        ho = pl.pallas_call(
            functools.partial(_hops_kernel, gdep=gdep, alpha=alpha,
                              ct=ct, seq_len=L),
            out_shape=jax.ShapeDtypeStruct((N, gdep, C, V, L), x.dtype),
            grid=(N, ncb),
            in_specs=[
                pl.BlockSpec((V, V), lambda n, j: (0, 0)),
                pl.BlockSpec((None, V, tf), lambda n, j: (n, 0, j)),
            ],
            out_specs=pl.BlockSpec((None, gdep, ct, V, L),
                                   lambda n, j: (n, 0, j, 0, 0)),
            compiler_params=pltpu.CompilerParams(
                dimension_semantics=("parallel", "parallel")),
            cost_estimate=hops_cost,
        )(a, x2)

        # (N, gdep, C, V, L) -> (N, gdep*C, V*L): pure metadata reshape
        # (contiguous leading & trailing merges) — no XLA copy kernel.
        hops = ho.reshape(N, gdep * C, VL)
        wr = w[:, C:]

    # 3) Fused 1x1 conv, concat-free, with the V*L lane dim tiled so blocks fit
    #    scoped VMEM on all generations.  A ragged last VL tile (if any) only
    #    produces masked padded columns that are discarded on store.
    tvl = VL if VL <= max_vl_tile else max_vl_tile
    nvl = pl.cdiv(VL, tvl)
    mlp_cost = pl.CostEstimate(
        flops=int(2 * N * c_out * KC * VL),
        transcendentals=0,
        bytes_accessed=int(isz * (N * KC * VL + N * c_out * VL + c_out * KC)
                           + 4 * c_out))

    if gdep > 0:
        out2 = pl.pallas_call(
            _mlp_kernel,
            out_shape=jax.ShapeDtypeStruct((N, c_out, VL), x.dtype),
            grid=(N, nvl),
            in_specs=[
                pl.BlockSpec((c_out, C), lambda n, t: (0, 0)),
                pl.BlockSpec((c_out, gdep * C), lambda n, t: (0, 0)),
                pl.BlockSpec((c_out, 1), lambda n, t: (0, 0)),
                pl.BlockSpec((None, C, tvl), lambda n, t: (n, 0, t)),
                pl.BlockSpec((None, gdep * C, tvl), lambda n, t: (n, 0, t)),
            ],
            out_specs=pl.BlockSpec((None, c_out, tvl), lambda n, t: (n, 0, t)),
            compiler_params=pltpu.CompilerParams(
                dimension_semantics=("parallel", "parallel")),
            cost_estimate=mlp_cost,
        )(w0, wr, b2, x0, hops)
    else:
        out2 = pl.pallas_call(
            _mlp_kernel_x_only,
            out_shape=jax.ShapeDtypeStruct((N, c_out, VL), x.dtype),
            grid=(N, nvl),
            in_specs=[
                pl.BlockSpec((c_out, C), lambda n, t: (0, 0)),
                pl.BlockSpec((c_out, 1), lambda n, t: (0, 0)),
                pl.BlockSpec((None, C, tvl), lambda n, t: (n, 0, t)),
            ],
            out_specs=pl.BlockSpec((None, c_out, tvl), lambda n, t: (n, 0, t)),
            compiler_params=pltpu.CompilerParams(
                dimension_semantics=("parallel", "parallel")),
            cost_estimate=mlp_cost,
        )(w0, b2, x0)

    return out2.reshape(N, c_out, V, L)


def mixprop_ref(x, adj, w, b, *, gdep, alpha):
    """Pure-JAX reference mirroring the PyTorch forward."""
    V = adj.shape[0]
    adj = adj + jnp.eye(V, dtype=adj.dtype)
    d = adj.sum(1)
    a = adj / d[:, None]
    h = x
    out = [h]
    for _ in range(gdep):
        h = alpha * x + (1.0 - alpha) * jnp.einsum('ncwl,vw->ncvl', h, a)
        out.append(h)
    ho = jnp.concatenate(out, axis=1)                     # (N, (gdep+1)*C, V, L)
    return jnp.einsum('oc,ncvl->novl', w, ho) + b[None, :, None, None]


if __name__ == "__main__":
    # Small shapes consistent with the module.
    N, C_IN, V, L = 2, 4, 16, 8
    GDEP, ALPHA, C_OUT = 2, 0.05, 8
    DTYPE = jnp.float32

    key = jax.random.PRNGKey(0)
    kx, kadj, kw, kb = jax.random.split(key, 4)

    x = jax.random.normal(kx, (N, C_IN, V, L), dtype=DTYPE)
    # Non-negative adjacency (typical learned graph), keeps row sums > 0.
    adj = jax.random.uniform(kadj, (V, V), dtype=DTYPE)

    # 1x1-conv (linear) params: weight (c_out, (gdep+1)*c_in), bias (c_out,)
    fan_in = (GDEP + 1) * C_IN
    bound = 1.0 / jnp.sqrt(fan_in)
    w = jax.random.uniform(kw, (C_OUT, fan_in), dtype=DTYPE,
                           minval=-bound, maxval=bound)
    b = jax.random.uniform(kb, (C_OUT,), dtype=DTYPE,
                           minval=-bound, maxval=bound)

    fwd = jax.jit(functools.partial(mixprop_forward, gdep=GDEP, alpha=ALPHA))
    out = jax.block_until_ready(fwd(x, adj, w, b))

    ref = mixprop_ref(x, adj, w, b, gdep=GDEP, alpha=ALPHA)
    assert out.shape == (N, C_OUT, V, L)
    assert jnp.allclose(out, ref, atol=1e-4, rtol=1e-4), "mismatch vs reference"

    print("KERNEL_OK")
</pallas_src>

<mosaic_0001>
module attributes {stable_mosaic.version = 11 : i64} {
  func.func @_hops_kernel(%arg0: i32, %arg1: i32, %arg2: memref<16x16xf32, #tpu.memory_space<vmem>>, %arg3: memref<1x16x32xf32, #tpu.memory_space<vmem>>, %arg4: memref<1x2x4x16x8xf32, #tpu.memory_space<vmem>>) attributes {dimension_semantics = [#tpu.dimension_semantics<parallel>, #tpu.dimension_semantics<parallel>], iteration_bounds = array<i64: 2, 1>, scalar_prefetch = 0 : i64, scratch_operands = 0 : i64, tpu.core_type = #tpu.core_type<tc>, window_params = [{pipeline_mode = #tpu.pipeline_mode<synchronous>, transform_indices = @transform_0, window_bounds = array<i64: 16, 16>}, {transform_indices = @transform_1, window_bounds = array<i64: 1, 16, 32>}, {transform_indices = @transform_2, window_bounds = array<i64: 1, 2, 4, 16, 8>}]} {
    %c0 = arith.constant 0 : index
    %c0_0 = arith.constant 0 : index
    %0 = vector.load %arg2[%c0, %c0_0] : memref<16x16xf32, #tpu.memory_space<vmem>>, vector<16x16xf32>
    %c0_1 = arith.constant 0 : index
    %c0_2 = arith.constant 0 : index
    %c0_3 = arith.constant 0 : index
    %1 = vector.load %arg3[%c0_1, %c0_2, %c0_3] : memref<1x16x32xf32, #tpu.memory_space<vmem>>, vector<1x16x32xf32>
    %2 = vector.shape_cast %1 : vector<1x16x32xf32> to vector<16x32xf32>
    %cst = arith.constant 5.000000e-02 : f32
    %3 = vector.broadcast %cst : f32 to vector<16x32xf32>
    %4 = arith.mulf %3, %2 : vector<16x32xf32>
    %cst_4 = arith.constant dense<0.000000e+00> : vector<16x32xf32>
    %5 = tpu.matmul %0, %2, %cst_4 {dimension_numbers = #tpu.dot_dimension_numbers<[1], [0], [0], [1], [0, 0, 1, 1], [], []>} : vector<16x16xf32>, vector<16x32xf32>, vector<16x32xf32> -> vector<16x32xf32>
    %cst_5 = arith.constant 0.949999988 : f32
    %6 = vector.broadcast %cst_5 : f32 to vector<16x32xf32>
    %7 = arith.mulf %6, %5 : vector<16x32xf32>
    %8 = arith.addf %4, %7 : vector<16x32xf32>
    %9 = vector.extract_strided_slice %8 {offsets = [0, 0], sizes = [16, 8], strides = [1, 1]} : vector<16x32xf32> to vector<16x8xf32>
    %c0_6 = arith.constant 0 : index
    %c0_7 = arith.constant 0 : index
    %c0_8 = arith.constant 0 : index
    %c0_9 = arith.constant 0 : index
    %c0_10 = arith.constant 0 : index
    %10 = vector.load %arg4[%c0_6, %c0_7, %c0_8, %c0_9, %c0_10] : memref<1x2x4x16x8xf32, #tpu.memory_space<vmem>>, vector<1x1x1x16x8xf32>
    %11 = vector.shape_cast %10 : vector<1x1x1x16x8xf32> to vector<16x8xf32>
    %12 = vector.shape_cast %9 : vector<16x8xf32> to vector<1x1x1x16x8xf32>
    tpu.vector_store %arg4[%c0_6, %c0_7, %c0_8, %c0_9, %c0_10], %12 {strides = array<i32>} : memref<1x2x4x16x8xf32, #tpu.memory_space<vmem>>, vector<1x1x1x16x8xf32>,
    %13 = vector.extract_strided_slice %8 {offsets = [0, 8], sizes = [16, 8], strides = [1, 1]} : vector<16x32xf32> to vector<16x8xf32>
    %c0_11 = arith.constant 0 : index
    %c0_12 = arith.constant 0 : index
    %c1 = arith.constant 1 : index
    %c0_13 = arith.constant 0 : index
    %c0_14 = arith.constant 0 : index
    %14 = vector.load %arg4[%c0_11, %c0_12, %c1, %c0_13, %c0_14] : memref<1x2x4x16x8xf32, #tpu.memory_space<vmem>>, vector<1x1x1x16x8xf32>
    %15 = vector.shape_cast %14 : vector<1x1x1x16x8xf32> to vector<16x8xf32>
    %16 = vector.shape_cast %13 : vector<16x8xf32> to vector<1x1x1x16x8xf32>
    tpu.vector_store %arg4[%c0_11, %c0_12, %c1, %c0_13, %c0_14], %16 {strides = array<i32>} : memref<1x2x4x16x8xf32, #tpu.memory_space<vmem>>, vector<1x1x1x16x8xf32>,
    %17 = vector.extract_strided_slice %8 {offsets = [0, 16], sizes = [16, 8], strides = [1, 1]} : vector<16x32xf32> to vector<16x8xf32>
    %c0_15 = arith.constant 0 : index
    %c0_16 = arith.constant 0 : index
    %c2 = arith.constant 2 : index
    %c0_17 = arith.constant 0 : index
    %c0_18 = arith.constant 0 : index
    %18 = vector.load %arg4[%c0_15, %c0_16, %c2, %c0_17, %c0_18] : memref<1x2x4x16x8xf32, #tpu.memory_space<vmem>>, vector<1x1x1x16x8xf32>
    %19 = vector.shape_cast %18 : vector<1x1x1x16x8xf32> to vector<16x8xf32>
    %20 = vector.shape_cast %17 : vector<16x8xf32> to vector<1x1x1x16x8xf32>
    tpu.vector_store %arg4[%c0_15, %c0_16, %c2, %c0_17, %c0_18], %20 {strides = array<i32>} : memref<1x2x4x16x8xf32, #tpu.memory_space<vmem>>, vector<1x1x1x16x8xf32>,
    %21 = vector.extract_strided_slice %8 {offsets = [0, 24], sizes = [16, 8], strides = [1, 1]} : vector<16x32xf32> to vector<16x8xf32>
    %c0_19 = arith.constant 0 : index
    %c0_20 = arith.constant 0 : index
    %c3 = arith.constant 3 : index
    %c0_21 = arith.constant 0 : index
    %c0_22 = arith.constant 0 : index
    %22 = vector.load %arg4[%c0_19, %c0_20, %c3, %c0_21, %c0_22] : memref<1x2x4x16x8xf32, #tpu.memory_space<vmem>>, vector<1x1x1x16x8xf32>
    %23 = vector.shape_cast %22 : vector<1x1x1x16x8xf32> to vector<16x8xf32>
    %24 = vector.shape_cast %21 : vector<16x8xf32> to vector<1x1x1x16x8xf32>
    tpu.vector_store %arg4[%c0_19, %c0_20, %c3, %c0_21, %c0_22], %24 {strides = array<i32>} : memref<1x2x4x16x8xf32, #tpu.memory_space<vmem>>, vector<1x1x1x16x8xf32>,
    %cst_23 = arith.constant dense<0.000000e+00> : vector<16x32xf32>
    %25 = tpu.matmul %0, %8, %cst_23 {dimension_numbers = #tpu.dot_dimension_numbers<[1], [0], [0], [1], [0, 0, 1, 1], [], []>} : vector<16x16xf32>, vector<16x32xf32>, vector<16x32xf32> -> vector<16x32xf32>
    %cst_24 = arith.constant 0.949999988 : f32
    %26 = vector.broadcast %cst_24 : f32 to vector<16x32xf32>
    %27 = arith.mulf %26, %25 : vector<16x32xf32>
    %28 = arith.addf %4, %27 : vector<16x32xf32>
    %29 = vector.extract_strided_slice %28 {offsets = [0, 0], sizes = [16, 8], strides = [1, 1]} : vector<16x32xf32> to vector<16x8xf32>
    %c0_25 = arith.constant 0 : index
    %c1_26 = arith.constant 1 : index
    %c0_27 = arith.constant 0 : index
    %c0_28 = arith.constant 0 : index
    %c0_29 = arith.constant 0 : index
    %30 = vector.load %arg4[%c0_25, %c1_26, %c0_27, %c0_28, %c0_29] : memref<1x2x4x16x8xf32, #tpu.memory_space<vmem>>, vector<1x1x1x16x8xf32>
    %31 = vector.shape_cast %30 : vector<1x1x1x16x8xf32> to vector<16x8xf32>
    %32 = vector.shape_cast %29 : vector<16x8xf32> to vector<1x1x1x16x8xf32>
    tpu.vector_store %arg4[%c0_25, %c1_26, %c0_27, %c0_28, %c0_29], %32 {strides = array<i32>} : memref<1x2x4x16x8xf32, #tpu.memory_space<vmem>>, vector<1x1x1x16x8xf32>,
    %33 = vector.extract_strided_slice %28 {offsets = [0, 8], sizes = [16, 8], strides = [1, 1]} : vector<16x32xf32> to vector<16x8xf32>
    %c0_30 = arith.constant 0 : index
    %c1_31 = arith.constant 1 : index
    %c1_32 = arith.constant 1 : index
    %c0_33 = arith.constant 0 : index
    %c0_34 = arith.constant 0 : index
    %34 = vector.load %arg4[%c0_30, %c1_31, %c1_32, %c0_33, %c0_34] : memref<1x2x4x16x8xf32, #tpu.memory_space<vmem>>, vector<1x1x1x16x8xf32>
    %35 = vector.shape_cast %34 : vector<1x1x1x16x8xf32> to vector<16x8xf32>
    %36 = vector.shape_cast %33 : vector<16x8xf32> to vector<1x1x1x16x8xf32>
    tpu.vector_store %arg4[%c0_30, %c1_31, %c1_32, %c0_33, %c0_34], %36 {strides = array<i32>} : memref<1x2x4x16x8xf32, #tpu.memory_space<vmem>>, vector<1x1x1x16x8xf32>,
    %37 = vector.extract_strided_slice %28 {offsets = [0, 16], sizes = [16, 8], strides = [1, 1]} : vector<16x32xf32> to vector<16x8xf32>
    %c0_35 = arith.constant 0 : index
    %c1_36 = arith.constant 1 : index
    %c2_37 = arith.constant 2 : index
    %c0_38 = arith.constant 0 : index
    %c0_39 = arith.constant 0 : index
    %38 = vector.load %arg4[%c0_35, %c1_36, %c2_37, %c0_38, %c0_39] : memref<1x2x4x16x8xf32, #tpu.memory_space<vmem>>, vector<1x1x1x16x8xf32>
    %39 = vector.shape_cast %38 : vector<1x1x1x16x8xf32> to vector<16x8xf32>
    %40 = vector.shape_cast %37 : vector<16x8xf32> to vector<1x1x1x16x8xf32>
    tpu.vector_store %arg4[%c0_35, %c1_36, %c2_37, %c0_38, %c0_39], %40 {strides = array<i32>} : memref<1x2x4x16x8xf32, #tpu.memory_space<vmem>>, vector<1x1x1x16x8xf32>,
    %41 = vector.extract_strided_slice %28 {offsets = [0, 24], sizes = [16, 8], strides = [1, 1]} : vector<16x32xf32> to vector<16x8xf32>
    %c0_40 = arith.constant 0 : index
    %c1_41 = arith.constant 1 : index
    %c3_42 = arith.constant 3 : index
    %c0_43 = arith.constant 0 : index
    %c0_44 = arith.constant 0 : index
    %42 = vector.load %arg4[%c0_40, %c1_41, %c3_42, %c0_43, %c0_44] : memref<1x2x4x16x8xf32, #tpu.memory_space<vmem>>, vector<1x1x1x16x8xf32>
    %43 = vector.shape_cast %42 : vector<1x1x1x16x8xf32> to vector<16x8xf32>
    %44 = vector.shape_cast %41 : vector<16x8xf32> to vector<1x1x1x16x8xf32>
    tpu.vector_store %arg4[%c0_40, %c1_41, %c3_42, %c0_43, %c0_44], %44 {strides = array<i32>} : memref<1x2x4x16x8xf32, #tpu.memory_space<vmem>>, vector<1x1x1x16x8xf32>,
    return
  }
  func.func @transform_0(%arg0: i32, %arg1: i32) -> (i32, i32) {
    %c0_i32 = arith.constant 0 : i32
    %c0_i32_0 = arith.constant 0 : i32
    %c0_i32_1 = arith.constant 0 : i32
    return %c0_i32, %c0_i32_0 : i32, i32
  }
  func.func @transform_1(%arg0: i32, %arg1: i32) -> (i32, i32, i32) {
    %c0_i32 = arith.constant 0 : i32
    %c0_i32_0 = arith.constant 0 : i32
    return %arg0, %c0_i32, %arg1 : i32, i32, i32
  }
  func.func @transform_2(%arg0: i32, %arg1: i32) -> (i32, i32, i32, i32, i32) {
    %c0_i32 = arith.constant 0 : i32
    %c0_i32_0 = arith.constant 0 : i32
    %c0_i32_1 = arith.constant 0 : i32
    %c0_i32_2 = arith.constant 0 : i32
    return %arg0, %c0_i32, %arg1, %c0_i32_0, %c0_i32_1 : i32, i32, i32, i32, i32
  }
}

module attributes {stable_mosaic.version = 11 : i64} {
  func.func @_mlp_kernel(%arg0: i32, %arg1: i32, %arg2: memref<8x4xf32, #tpu.memory_space<vmem>>, %arg3: memref<8x8xf32, #tpu.memory_space<vmem>>, %arg4: memref<8x1xf32, #tpu.memory_space<vmem>>, %arg5: memref<1x4x128xf32, #tpu.memory_space<vmem>>, %arg6: memref<1x8x128xf32, #tpu.memory_space<vmem>>, %arg7: memref<1x8x128xf32, #tpu.memory_space<vmem>>) attributes {dimension_semantics = [#tpu.dimension_semantics<parallel>, #tpu.dimension_semantics<parallel>], iteration_bounds = array<i64: 2, 1>, scalar_prefetch = 0 : i64, scratch_operands = 0 : i64, tpu.core_type = #tpu.core_type<tc>, window_params = [{pipeline_mode = #tpu.pipeline_mode<synchronous>, transform_indices = @transform_0, window_bounds = array<i64: 8, 4>}, {pipeline_mode = #tpu.pipeline_mode<synchronous>, transform_indices = @transform_1, window_bounds = array<i64: 8, 8>}, {pipeline_mode = #tpu.pipeline_mode<synchronous>, transform_indices = @transform_2, window_bounds = array<i64: 8, 1>}, {transform_indices = @transform_3, window_bounds = array<i64: 1, 4, 128>}, {transform_indices = @transform_4, window_bounds = array<i64: 1, 8, 128>}, {transform_indices = @transform_5, window_bounds = array<i64: 1, 8, 128>}]} {
    %c0 = arith.constant 0 : index
    %c0_0 = arith.constant 0 : index
    %0 = vector.load %arg2[%c0, %c0_0] : memref<8x4xf32, #tpu.memory_space<vmem>>, vector<8x4xf32>
    %c0_1 = arith.constant 0 : index
    %c0_2 = arith.constant 0 : index
    %c0_3 = arith.constant 0 : index
    %1 = vector.load %arg5[%c0_1, %c0_2, %c0_3] : memref<1x4x128xf32, #tpu.memory_space<vmem>>, vector<1x4x128xf32>
    %2 = vector.shape_cast %1 : vector<1x4x128xf32> to vector<4x128xf32>
    %cst = arith.constant dense<0.000000e+00> : vector<8x128xf32>
    %3 = tpu.matmul %0, %2, %cst {dimension_numbers = #tpu.dot_dimension_numbers<[1], [0], [0], [1], [0, 0, 1, 1], [], []>} : vector<8x4xf32>, vector<4x128xf32>, vector<8x128xf32> -> vector<8x128xf32>
    %c0_4 = arith.constant 0 : index
    %c0_5 = arith.constant 0 : index
    %4 = vector.load %arg3[%c0_4, %c0_5] : memref<8x8xf32, #tpu.memory_space<vmem>>, vector<8x8xf32>
    %c0_6 = arith.constant 0 : index
    %c0_7 = arith.constant 0 : index
    %c0_8 = arith.constant 0 : index
    %5 = vector.load %arg6[%c0_6, %c0_7, %c0_8] : memref<1x8x128xf32, #tpu.memory_space<vmem>>, vector<1x8x128xf32>
    %6 = vector.shape_cast %5 : vector<1x8x128xf32> to vector<8x128xf32>
    %cst_9 = arith.constant dense<0.000000e+00> : vector<8x128xf32>
    %7 = tpu.matmul %4, %6, %cst_9 {dimension_numbers = #tpu.dot_dimension_numbers<[1], [0], [0], [1], [0, 0, 1, 1], [], []>} : vector<8x8xf32>, vector<8x128xf32>, vector<8x128xf32> -> vector<8x128xf32>
    %8 = arith.addf %3, %7 : vector<8x128xf32>
    %c0_10 = arith.constant 0 : index
    %c0_11 = arith.constant 0 : index
    %9 = vector.load %arg4[%c0_10, %c0_11] : memref<8x1xf32, #tpu.memory_space<vmem>>, vector<8x1xf32>
    %10 = vector.broadcast %9 : vector<8x1xf32> to vector<8x128xf32>
    %11 = arith.addf %8, %10 : vector<8x128xf32>
    %c0_12 = arith.constant 0 : index
    %c0_13 = arith.constant 0 : index
    %c0_14 = arith.constant 0 : index
    %12 = vector.load %arg7[%c0_12, %c0_13, %c0_14] : memref<1x8x128xf32, #tpu.memory_space<vmem>>, vector<1x8x128xf32>
    %13 = vector.shape_cast %12 : vector<1x8x128xf32> to vector<8x128xf32>
    %14 = vector.shape_cast %11 : vector<8x128xf32> to vector<1x8x128xf32>
    tpu.vector_store %arg7[%c0_12, %c0_13, %c0_14], %14 {strides = array<i32>} : memref<1x8x128xf32, #tpu.memory_space<vmem>>, vector<1x8x128xf32>,
    return
  }
  func.func @transform_0(%arg0: i32, %arg1: i32) -> (i32, i32) {
    %c0_i32 = arith.constant 0 : i32
    %c0_i32_0 = arith.constant 0 : i32
    %c0_i32_1 = arith.constant 0 : i32
    return %c0_i32, %c0_i32_0 : i32, i32
  }
  func.func @transform_1(%arg0: i32, %arg1: i32) -> (i32, i32) {
    %c0_i32 = arith.constant 0 : i32
    %c0_i32_0 = arith.constant 0 : i32
    %c0_i32_1 = arith.constant 0 : i32
    return %c0_i32, %c0_i32_0 : i32, i32
  }
  func.func @transform_2(%arg0: i32, %arg1: i32) -> (i32, i32) {
    %c0_i32 = arith.constant 0 : i32
    %c0_i32_0 = arith.constant 0 : i32
    %c0_i32_1 = arith.constant 0 : i32
    return %c0_i32, %c0_i32_0 : i32, i32
  }
  func.func @transform_3(%arg0: i32, %arg1: i32) -> (i32, i32, i32) {
    %c0_i32 = arith.constant 0 : i32
    %c0_i32_0 = arith.constant 0 : i32
    return %arg0, %c0_i32, %arg1 : i32, i32, i32
  }
  func.func @transform_4(%arg0: i32, %arg1: i32) -> (i32, i32, i32) {
    %c0_i32 = arith.constant 0 : i32
    %c0_i32_0 = arith.constant 0 : i32
    return %arg0, %c0_i32, %arg1 : i32, i32, i32
  }
  func.func @transform_5(%arg0: i32, %arg1: i32) -> (i32, i32, i32) {
    %c0_i32 = arith.constant 0 : i32
    %c0_i32_0 = arith.constant 0 : i32
    return %arg0, %c0_i32, %arg1 : i32, i32, i32
  }
}

</mosaic_0001>

<bundles_post_ra>
// kernel: mixprop_forward.3
= control target key start
LH: loop header
LB: loop body
LE: loop exit
PB: predicated region body
PF: predicated region fallthrough
CT: control target
= control target key end

     0   :  { %s526_s18 = smov 0   ;;  %s528_s19 = smov 0   ;;  %s571_s0 = inlined_call_operand.vmem [shape: f32[8,4], index: 0, kind: input, shape index: {}]   ;;  %s572_s1 = inlined_call_operand.vmem [shape: f32[8,8], index: 1, kind: input, shape index: {}]   ;;  %s573_s2 = inlined_call_operand.vmem [shape: f32[8,1], index: 2, kind: input, shape index: {}]   ;;  %s574_s3 = inlined_call_operand.vmem [shape: f32[2,4,128], index: 3, kind: input, shape index: {}]   ;;  %s575_s4 = inlined_call_operand.vmem [shape: f32[2,8,128], index: 4, kind: input, shape index: {}]   ;;  %s576_s5 = inlined_call_operand.vmem [shape: f32[2,8,128], index: 5, kind: output, shape index: {}]  }
   0x1   :  { %s530_s20 = smov 0  }
   0x2 LB: > { %s27_s21 = sadd.s32 1, %s489_s19  ;;  %p436_p0 = scmp.ge.s32.totalorder %s493_s20, 1  ;;  %s493_s20 = sphi %s530_s20, %s15_s20   ;;  %s489_s19 = sphi %s528_s19, %s578_s19   ;;  %s485_s18 = sphi %s526_s18, %s577_s18  }
   0x3   : > { %p29_p1 = scmp.ge.s32.totalorder %s27_s21, 2  ;;  %p219_p2 = scmp.lt.s32.totalorder %s493_s20, 3 }
   0x5   : > { %s580_s21 = smov (%p29_p1, %s27_s21), 0  ;;  %p220_p3 = pnand %p436_p0, %p219_p2 }
   0x6   : > { %p258_p4 = scmp.lt.s32.totalorder (!%p220_p3), %s485_s18, 1 }
   0x7   : > { %223 = sbr.rel (%p220_p3) target bundleno = 149 (0x95), region = 40 }
   0xc   : > { %v335_v0 = vld [vmem:[%s573_s2] sm:$0xff]  ;;  %s582_s18 = smov (!%p258_p4, %s485_s18), 1  ;;  %v495_v1 = vmov 0   ;;  %vm311_vm0 = vcmask 1043456   ;;  %vm283_vm1 = vcmask 64512   ;;  %vm307_vm2 = vcmask 31744  }
   0xd   : > { %470 = vset.pattern.permute.xlu0 %v495_v1  ;;  %s438_s24 = sshll.u32 %s582_s18, 3  ;;  %s437_s25 = sshll.u32 %s582_s18, 2  ;;  %v281_v2 = vld [vmem:[%s572_s1] sm:$0xff] }
   0xe   : > { %338 = vperm.xlu0 %470, %v335_v0   ;;  %s271_s28 = scalar_lea.vmem %s575_s4, %s438_s24  ;;  %s264_s8 = scalar_lea.vmem %s574_s3, %s437_s25  ;;  %v279_v4 = vld [vmem:[%s571_s0] sm:$0xff] }
   0xf   : > { %v282_v3 = vld [vmem:[%s271_s28] sm:$0xff]  ;;  %s278_s13 = scalar_lea.vmem %s576_s5, %s438_s24 }
  0x10   : > { %302 = vmatpush.msra.mxu0 %v282_v3  ;;  %v280_v5 = vld [vmem:[%s264_s8] sm:$0xf] }
  0x11   : > { %441 = vmatpush.msk.msra.mxu1 %vm311_vm0, %v280_v5  ;;  %440 = vmatmul.msk.f32.vlgmr.msra.gmra.mxu0 %vm283_vm1, %v281_v2 }
  0x12   : > { %442 = vmatmul.msk.f32.vlgmr.msra.gmra.mxu1 %vm307_vm2, %v279_v4 }
  0x80   : > { %v339_v8 = vpop.permute.xlu0 %338 }
  0x8e   : > { %v304_v6 = vpop.f32.mrf.mxu0 }
  0x8f   : > { %v332_v7 = vpop.f32.mrf.mxu1 }
  0x90   : > { %v333_v9 = vadd.f32 %v332_v7, %v304_v6 }
  0x92   : > { %v341_v10 = vadd.f32 %v339_v8, %v333_v9 }
  0x94   : > { %342 = vst [vmem:[%s278_s13] sm:$0xff] %v341_v10 }
  0x95 PF: > { %s15_s20 = sadd.s32 1, %s493_s20   ;;  %s577_s18 = smov %s489_s19 }
  0x96   : > { %p12_p5 = scmp.ge.s32.totalorder %s15_s20, 4   ;;  %s578_s19 = smov %s580_s21 }
  0x98   :  { %14 = sbr.rel (!%p12_p5) target bundleno = 2 (0x2), region = 73 }

// kernel: mixprop_forward.2
= control target key start
LH: loop header
LB: loop body
LE: loop exit
PB: predicated region body
PF: predicated region fallthrough
CT: control target
= control target key end

     0   :  { %s508_s9 = smov 0   ;;  %s510_s10 = smov 0   ;;  %s597_s0 = inlined_call_operand.vmem [shape: f32[16,16], index: 0, kind: input, shape index: {}]   ;;  %s598_s1 = inlined_call_operand.vmem [shape: f32[2,16,32], index: 1, kind: input, shape index: {}]   ;;  %s599_s2 = inlined_call_operand.vmem [shape: f32[2,2,4,16,8], index: 2, kind: output, shape index: {}]  }
   0x1   :  { %s512_s11 = smov 0  }
   0x2 LB: > { %s24_s12 = sadd.s32 1, %s484_s10  ;;  %p408_p0 = scmp.ge.s32.totalorder %s488_s11, 1  ;;  %s488_s11 = sphi %s512_s11, %s12_s11   ;;  %s484_s10 = sphi %s510_s10, %s601_s10   ;;  %s480_s9 = sphi %s508_s9, %s600_s9  }
   0x3   : > { %p26_p1 = scmp.ge.s32.totalorder %s24_s12, 2  ;;  %p131_p2 = scmp.lt.s32.totalorder %s488_s11, 3 }
   0x5   : > { %s603_s12 = smov (%p26_p1, %s24_s12), 0  ;;  %p132_p3 = pnand %p408_p0, %p131_p2 }
   0x6   : > { %p161_p4 = scmp.lt.s32.totalorder (!%p132_p3), %s480_s9, 1  ;;  %s490_s25 = smov (!%p132_p3), 104  }
   0x7   : > { %135 = sbr.rel (%p132_p3) target bundleno = 420 (0x1a4), region = 28  ;;  %s491_s26 = smov (!%p132_p3), 112  }
   0x8   : > { %s492_s27 = smov (!%p132_p3), 120  }
   0xc   : > { %s605_s9 = smov (!%p161_p4, %s480_s9), 1  ;;  %v180_v2 = vld [vmem:[%s597_s0] sm:$0xff]  ;;  %vm186_vm0 = vcmask 130048   ;;  %v181_v3 = vld [vmem:[%s597_s0 + $0x8] sm:$0xff]  ;;  %vm220_vm1 = vcmask 64512  }
   0xd   : > { %s433_s13 = sshll.u32 %s605_s9, 4  ;;  %s434_s21 = sshll.u32 %s605_s9, 7 }
   0xe   : > { %s168_s16 = scalar_lea.vmem %s598_s1, %s433_s13  ;;  %s540_s24 = scalar_lea.vmem %s599_s2, %s434_s21 }
   0xf   : > { %v183_v0 = vld [vmem:[%s168_s16 + $0x8] sm:$0xff]  ;;  %v182_v1 = vld [vmem:[%s168_s16] sm:$0xff] }
  0x10   : > { %207 = vmatpush.msra.mxu0 %v183_v0  ;;  %435 = vmatpush.msra.mxu2 %v183_v0  ;;  %v184_v4 = vmul.f32 0.05, %v182_v1  ;;  %v185_v8 = vmul.f32 0.05, %v183_v0 }
  0x12   : > { %208 = vmatpush.msra.mxu0 %v182_v1  ;;  %436 = vmatpush.msra.mxu2 %v182_v1 }
  0x13   : > { %413 = vmatmul.msk.f32.vlgmr.msra.gmra.mxu0 %vm186_vm0, %v180_v2  ;;  %414 = vmatmul.msk.f32.vlgmr.msra.gmra.mxu2 %vm186_vm0, %v181_v3 }
  0x90   : > { %v210_v5 = vpop.f32.mrf.mxu0 }
  0x91   : > { %v216_v6 = vmul.f32 0.95, %v210_v5 }
  0x93   : > { %v218_v7 = vadd.f32 %v216_v6, %v184_v4 }
  0x95   : > { %221 = vst.msk [vmem:[%s540_s24] sm:$0xff] %vm220_vm1, %v218_v7  ;;  %243 = vrot.lane.b32.xlu2 %v218_v7, %s490_s25  ;;  %234 = vrot.lane.b32.xlu1 %v218_v7, %s491_s26 }
  0x96   : > { %225 = vrot.lane.b32.xlu0 %v218_v7, %s492_s27  ;;  %v213_v9 = vpop.f32.mrf.mxu2 }
  0x97   : > { %v217_v10 = vmul.f32 0.95, %v213_v9 }
  0x99   : > { %v219_v11 = vadd.f32 %v217_v10, %v185_v8 }
  0x9b   : > { %222 = vst.msk [vmem:[%s540_s24 + $0x8] sm:$0xff] %vm220_vm1, %v219_v11  ;;  %266 = vmatpush.msra.mxu1 %v219_v11  ;;  %437 = vmatpush.msra.mxu3 %v219_v11 }
  0x9d   : > { %245 = vrot.lane.b32.xlu2 %v219_v11, %s490_s25  ;;  %236 = vrot.lane.b32.xlu1 %v219_v11, %s491_s26 }
  0x9e   : > { %227 = vrot.lane.b32.xlu0 %v219_v11, %s492_s27  ;;  %267 = vmatpush.msra.mxu1 %v218_v7 }
  0x9f   : > { %438 = vmatpush.msra.mxu3 %v218_v7  ;;  %421 = vmatmul.msk.f32.vlgmr.msra.gmra.mxu1 %vm186_vm0, %v180_v2 }
  0xa0   : > { %422 = vmatmul.msk.f32.vlgmr.msra.gmra.mxu3 %vm186_vm0, %v181_v3 }
  0xef   : > { %v244_v12 = vpop.permute.xlu2 %243 }
  0xf0   : > { %419 = vst.msk [vmem:[%s540_s24 + $0x30] sm:$0xff] %vm220_vm1, %v244_v12 }
  0xf7   : > { %v246_v13 = vpop.permute.xlu2 %245 }
  0xf8   : > { %420 = vst.msk [vmem:[%s540_s24 + $0x38] sm:$0xff] %vm220_vm1, %v246_v13 }
 0x107   : > { %v235_v14 = vpop.permute.xlu1 %234 }
 0x108   : > { %417 = vst.msk [vmem:[%s540_s24 + $0x20] sm:$0xff] %vm220_vm1, %v235_v14  ;;  %v226_v15 = vpop.permute.xlu0 %225 }
 0x109   : > { %415 = vst.msk [vmem:[%s540_s24 + $0x10] sm:$0xff] %vm220_vm1, %v226_v15 }
 0x10f   : > { %v237_v16 = vpop.permute.xlu1 %236 }
 0x110   : > { %418 = vst.msk [vmem:[%s540_s24 + $0x28] sm:$0xff] %vm220_vm1, %v237_v16  ;;  %v228_v17 = vpop.permute.xlu0 %227 }
 0x111   : > { %416 = vst.msk [vmem:[%s540_s24 + $0x18] sm:$0xff] %vm220_vm1, %v228_v17 }
 0x11c   : > { %v269_v18 = vpop.f32.mrf.mxu1 }
 0x11d   : > { %v275_v19 = vmul.f32 0.95, %v269_v18 }
 0x11f   : > { %v277_v20 = vadd.f32 %v275_v19, %v184_v4 }
 0x121   : > { %423 = vst.msk [vmem:[%s540_s24 + $0x40] sm:$0xff] %vm220_vm1, %v277_v20  ;;  %293 = vrot.lane.b32.xlu2 %v277_v20, %s491_s26  ;;  %284 = vrot.lane.b32.xlu0 %v277_v20, %s492_s27 }
 0x123   : > { %v272_v21 = vpop.f32.mrf.mxu3 }
 0x124   : > { %v276_v22 = vmul.f32 0.95, %v272_v21 }
 0x126   : > { %v278_v23 = vadd.f32 %v276_v22, %v185_v8 }
 0x128   : > { %424 = vst.msk [vmem:[%s540_s24 + $0x48] sm:$0xff] %vm220_vm1, %v278_v23  ;;  %286 = vrot.lane.b32.xlu1 %v278_v23, %s492_s27 }
 0x129   : > { %304 = vrot.lane.b32.xlu2 %v278_v23, %s490_s25  ;;  %295 = vrot.lane.b32.xlu0 %v278_v23, %s491_s26 }
 0x130   : > { %302 = vrot.lane.b32.xlu1 %v277_v20, %s490_s25 }
 0x17b   : > { %v294_v24 = vpop.permute.xlu2 %293 }
 0x17c   : > { %427 = vst.msk [vmem:[%s540_s24 + $0x60] sm:$0xff] %vm220_vm1, %v294_v24 }
 0x183   : > { %v305_v25 = vpop.permute.xlu2 %304 }
 0x184   : > { %430 = vst.msk [vmem:[%s540_s24 + $0x78] sm:$0xff] %vm220_vm1, %v305_v25 }
 0x193   : > { %v285_v26 = vpop.permute.xlu0 %284 }
 0x194   : > { %425 = vst.msk [vmem:[%s540_s24 + $0x50] sm:$0xff] %vm220_vm1, %v285_v26 }
 0x19a   : > { %v287_v27 = vpop.permute.xlu1 %286 }
 0x19b   : > { %426 = vst.msk [vmem:[%s540_s24 + $0x58] sm:$0xff] %vm220_vm1, %v287_v27  ;;  %v296_v28 = vpop.permute.xlu0 %295 }
 0x19c   : > { %428 = vst.msk [vmem:[%s540_s24 + $0x68] sm:$0xff] %vm220_vm1, %v296_v28 }
 0x1a2   : > { %v303_v29 = vpop.permute.xlu1 %302 }
 0x1a3   : > { %429 = vst.msk [vmem:[%s540_s24 + $0x70] sm:$0xff] %vm220_vm1, %v303_v29 }
 0x1a4 PF: > { %s12_s11 = sadd.s32 1, %s488_s11   ;;  %s600_s9 = smov %s484_s10 }
 0x1a5   : > { %p9_p5 = scmp.ge.s32.totalorder %s12_s11, 4   ;;  %s601_s10 = smov %s603_s12 }
 0x1a7   :  { %11 = sbr.rel (!%p9_p5) target bundleno = 2 (0x2), region = 65 }

</bundles_post_ra>
